<compile_context>
chip_gen: v6e
topology: v6e:2x2x1
jax: 0.10.0
libtpu: 0.0.40
codegen_flags: <defaults>
</compile_context>

<pallas_src>
import jax
import jax.numpy as jnp
from jax.experimental import pallas as pl
from jax.experimental.pallas import tpu as pltpu


# --------------------------------------------------------------------------
# Kernels
# --------------------------------------------------------------------------

def _single_tile_kernel(x_ref, ws_ref, wm_ref, bm_ref, o_ref):
    """Whole sequence in one block: plain softmax + pooled sum, no scratch."""
    x = x_ref[...]                                          # (TB, T, C) native dtype
    ws = ws_ref[...]                                        # (1, C)  (x's dtype)

    # Score branch: Linear(C -> 1) as VPU multiply (native dtype) + f32 lane reduce.
    s = jnp.sum((x * ws).astype(jnp.float32), axis=-1)      # (TB, T)

    # Softmax over the sequence dim (f32 stats).
    m = jnp.max(s, axis=-1, keepdims=True)                  # (TB, 1)
    p = jnp.exp(s - m)                                      # (TB, T)
    l = jnp.sum(p, axis=-1, keepdims=True)                  # (TB, 1)
    w = p / l                                               # exact normalization

    # Weighted pooling: products in native dtype, accumulate in f32.
    pooled = jnp.sum((w.astype(x.dtype)[:, :, None] * x).astype(jnp.float32),
                     axis=1)                                # (TB, C)

    # Output projection on the MXU in the weights' native dtype, f32 accumulate.
    wm = wm_ref[...]                                        # (C, Co)
    out = jnp.dot(pooled.astype(wm.dtype), wm,
                  preferred_element_type=jnp.float32)
    out = out + bm_ref[...]                                 # (1, Co) f32
    o_ref[...] = out.astype(o_ref.dtype)


def _make_tiled_kernel(T, tT, needs_t_mask):
    """Online-softmax pooling over sequence tiles (grid = (batch, seq))."""

    def kernel(x_ref, ws_ref, wm_ref, bm_ref, o_ref, m_sc, l_sc, acc_sc):
        # x_ref:  (TB, tT, C)   ws_ref: (1, C)   wm_ref: (C, Co)   bm_ref: (1, Co)
        # o_ref:  (TB, Co)
        # m_sc/l_sc: (TB, 1) f32 scratch; acc_sc: (TB, C) f32 scratch
        tj = pl.program_id(1)

        @pl.when(tj == 0)
        def _():
            m_sc[...] = jnp.full_like(m_sc, -jnp.inf)
            l_sc[...] = jnp.zeros_like(l_sc)
            acc_sc[...] = jnp.zeros_like(acc_sc)

        x = x_ref[...]                                      # native dtype
        ws = ws_ref[...]                                    # (1, C) x's dtype

        # Scores: native-dtype multiply, f32 lane reduce.
        s = jnp.sum((x * ws).astype(jnp.float32), axis=-1)  # (TB, tT)

        if needs_t_mask:
            # Last sequence tile extends past T: mask padded rows so they
            # contribute nothing (and OOB garbage can't leak via 0*NaN).
            t0 = tj * tT
            col = jax.lax.broadcasted_iota(jnp.int32, s.shape, 1) + t0
            valid = col < T
            s = jnp.where(valid, s, -jnp.inf)
            x = jnp.where(valid[:, :, None], x, jnp.zeros_like(x))

        # Online softmax accumulation over sequence tiles (f32 stats).
        m_prev = m_sc[...]                                               # (TB, 1)
        m_new = jnp.maximum(m_prev, jnp.max(s, axis=-1, keepdims=True))
        alpha = jnp.exp(m_prev - m_new)                                  # (TB, 1)
        p = jnp.exp(s - m_new)                                           # (TB, tT)
        l_sc[...] = alpha * l_sc[...] + jnp.sum(p, axis=-1, keepdims=True)
        contrib = jnp.sum((p.astype(x.dtype)[:, :, None] * x).astype(jnp.float32),
                          axis=1)                                        # (TB, C)
        acc_sc[...] = alpha * acc_sc[...] + contrib
        m_sc[...] = m_new

        @pl.when(tj == pl.num_programs(1) - 1)
        def _():
            pooled = acc_sc[...] / l_sc[...]                 # exact, once per block
            wm = wm_ref[...]
            out = jnp.dot(pooled.astype(wm.dtype), wm,
                          preferred_element_type=jnp.float32)
            out = out + bm_ref[...]
            o_ref[...] = out.astype(o_ref.dtype)

    return kernel


# --------------------------------------------------------------------------
# Tile selection
# --------------------------------------------------------------------------

def _select_tiles(B, T, C, itemsize, budget):
    """Pick (TB, tT) so the x block is ~budget bytes (double-buffered by Pallas)."""
    row_bytes = max(T * C * itemsize, 1)                     # one batch row, full seq

    if B <= 8:
        TB = B                                               # block dim == full dim
    else:
        # Budget-scaled batch rows per step (multiple of 8 for the (TB, Co) output
        # block), capped at ceil(B/2) rounded to 8 so there are always >= 2 batch
        # blocks for megacore sharding on 2-TC parts.
        tb_budget = max(8, (budget // row_bytes) // 8 * 8)
        tb_mega = max(8, ((-(-B // 2)) + 7) // 8 * 8)
        TB = min(tb_budget, tb_mega)

    if TB * row_bytes <= budget:
        tT = T
    else:
        per_trow = max(TB * C * itemsize, 1)
        tT_max = max(8, (budget // per_trow) // 8 * 8)
        if tT_max >= T:
            tT = T
        else:
            tT = tT_max
            # Prefer a multiple-of-8 divisor of T near tT_max so the padding
            # mask compiles out entirely.
            for cand in range(tT_max, max(8, tT_max // 2) - 1, -8):
                if T % cand == 0:
                    tT = cand
                    break
    return TB, tT


# --------------------------------------------------------------------------
# Wrapper
# --------------------------------------------------------------------------

def self_attention_pooling(x, w_score, b_score, w_mlp, b_mlp,
                           *, block_budget_bytes=4 * 1024 * 1024):
    """x: (B, T, C_in); w_score: (1, C_in); b_score: (1,);
    w_mlp: (C_out, C_in); b_mlp: (C_out,). Returns (B, C_out)."""
    B, T, C = x.shape
    Co = w_mlp.shape[0]

    # b_score is mathematically a no-op (softmax over seq is shift-invariant).
    del b_score

    ws = w_score.reshape(1, C).astype(x.dtype)        # score weight in x's dtype
    wm = w_mlp.T                                      # (C, Co), native weight dtype
    bm = b_mlp.reshape(1, Co).astype(jnp.float32)     # bias added in f32

    TB, tT = _select_tiles(B, T, C, x.dtype.itemsize, block_budget_bytes)
    nb = pl.cdiv(B, TB)
    nt = pl.cdiv(T, tT)
    needs_t_mask = (T % tT) != 0

    # TODO(synk): if production C_in < 128, all vector work runs at C/128 lane
    # utilization; a wrapper-level lane-dense repacking (fold timesteps into the
    # lane dim) would be needed to fix it without inflating HBM traffic.

    if nt == 1:
        # Fast path: whole sequence in one block, no scratch / online softmax.
        kernel = _single_tile_kernel
        grid = (nb,)
        in_specs = [
            pl.BlockSpec((TB, T, C), lambda i: (i, 0, 0)),
            pl.BlockSpec((1, C), lambda i: (0, 0)),
            pl.BlockSpec((C, Co), lambda i: (0, 0)),
            pl.BlockSpec((1, Co), lambda i: (0, 0)),
        ]
        out_specs = pl.BlockSpec((TB, Co), lambda i: (i, 0))
        scratch_shapes = []
        dims = ("parallel",)
    else:
        kernel = _make_tiled_kernel(T, tT, needs_t_mask)
        grid = (nb, nt)
        in_specs = [
            pl.BlockSpec((TB, tT, C), lambda i, j: (i, j, 0)),
            pl.BlockSpec((1, C), lambda i, j: (0, 0)),
            pl.BlockSpec((C, Co), lambda i, j: (0, 0)),
            pl.BlockSpec((1, Co), lambda i, j: (0, 0)),
        ]
        out_specs = pl.BlockSpec((TB, Co), lambda i, j: (i, 0))
        scratch_shapes = [
            pltpu.VMEM((TB, 1), jnp.float32),     # running max
            pltpu.VMEM((TB, 1), jnp.float32),     # running denom
            pltpu.VMEM((TB, C), jnp.float32),     # running weighted sum
        ]
        dims = ("parallel", "arbitrary")

    return pl.pallas_call(
        kernel,
        out_shape=jax.ShapeDtypeStruct((B, Co), x.dtype),
        grid_spec=pltpu.PrefetchScalarGridSpec(
            num_scalar_prefetch=0,
            grid=grid,
            in_specs=in_specs,
            out_specs=out_specs,
            scratch_shapes=scratch_shapes,
        ),
        compiler_params=pltpu.CompilerParams(
            dimension_semantics=dims,
            # ~4 MiB x block x 2 buffers + small scratch: safe on every
            # generation, including v7x's 64 MiB VMEM / 32 MiB scoped default.
            vmem_limit_bytes=32 * 1024 * 1024,
        ),
    )(x, ws, wm, bm)


# --------------------------------------------------------------------------
# Reference & test
# --------------------------------------------------------------------------

def _reference(x, w_score, b_score, w_mlp, b_mlp):
    s = jnp.einsum("btc,oc->bto", x, w_score) + b_score          # (B, T, 1)
    s = jax.nn.softmax(s, axis=1)
    pooled = jnp.sum(s * x, axis=1)                              # (B, C)
    return pooled @ w_mlp.T + b_mlp                              # (B, Co)


if __name__ == "__main__":
    key = jax.random.PRNGKey(0)
    kx, k1, k2, k3, k4 = jax.random.split(key, 5)

    B, T, C_in, C_out = 16, 8, 32, 16

    x = jax.random.normal(kx, (B, T, C_in), dtype=jnp.float32)
    w_score = jax.random.normal(k1, (1, C_in), dtype=jnp.float32) * 0.1
    b_score = jax.random.normal(k2, (1,), dtype=jnp.float32) * 0.1
    w_mlp = jax.random.normal(k3, (C_out, C_in), dtype=jnp.float32) * 0.1
    b_mlp = jax.random.normal(k4, (C_out,), dtype=jnp.float32) * 0.1

    # 1) Fast path: whole sequence in one block.
    out = self_attention_pooling(x, w_score, b_score, w_mlp, b_mlp)
    jax.block_until_ready(out)
    ref = _reference(x, w_score, b_score, w_mlp, b_mlp)
    assert out.shape == (B, C_out)
    assert jnp.allclose(out, ref, atol=1e-4, rtol=1e-4), "fast path mismatch"

    # 2) Tiled path (online softmax over sequence tiles), tT divides T -> no mask.
    T2 = 64
    x2 = jax.random.normal(kx, (B, T2, C_in), dtype=jnp.float32)
    out2 = self_attention_pooling(x2, w_score, b_score, w_mlp, b_mlp,
                                  block_budget_bytes=8 * 1024)
    jax.block_until_ready(out2)
    ref2 = _reference(x2, w_score, b_score, w_mlp, b_mlp)
    assert jnp.allclose(out2, ref2, atol=1e-4, rtol=1e-4), "tiled path mismatch"

    # 3) Tiled path with a ragged last sequence tile (masked path).
    T3 = 60
    x3 = jax.random.normal(kx, (B, T3, C_in), dtype=jnp.float32)
    out3 = self_attention_pooling(x3, w_score, b_score, w_mlp, b_mlp,
                                  block_budget_bytes=8 * 1024)
    jax.block_until_ready(out3)
    ref3 = _reference(x3, w_score, b_score, w_mlp, b_mlp)
    assert jnp.allclose(out3, ref3, atol=1e-4, rtol=1e-4), "masked tiled path mismatch"

    print("KERNEL_OK")
</pallas_src>

<mosaic_0001>
module attributes {stable_mosaic.version = 11 : i64} {
  func.func @_single_tile_kernel(%arg0: i32, %arg1: memref<8x8x32xf32, #tpu.memory_space<vmem>>, %arg2: memref<1x32xf32, #tpu.memory_space<vmem>>, %arg3: memref<32x16xf32, #tpu.memory_space<vmem>>, %arg4: memref<1x16xf32, #tpu.memory_space<vmem>>, %arg5: memref<8x16xf32, #tpu.memory_space<vmem>>) attributes {dimension_semantics = [#tpu.dimension_semantics<parallel>], iteration_bounds = array<i64: 2>, scalar_prefetch = 0 : i64, scratch_operands = 0 : i64, tpu.core_type = #tpu.core_type<tc>, window_params = [{transform_indices = @transform_0, window_bounds = array<i64: 8, 8, 32>}, {pipeline_mode = #tpu.pipeline_mode<synchronous>, transform_indices = @transform_1, window_bounds = array<i64: 1, 32>}, {pipeline_mode = #tpu.pipeline_mode<synchronous>, transform_indices = @transform_2, window_bounds = array<i64: 32, 16>}, {pipeline_mode = #tpu.pipeline_mode<synchronous>, transform_indices = @transform_3, window_bounds = array<i64: 1, 16>}, {transform_indices = @transform_4, window_bounds = array<i64: 8, 16>}]} {
    %c0 = arith.constant 0 : index
    %c0_0 = arith.constant 0 : index
    %c0_1 = arith.constant 0 : index
    %0 = vector.load %arg1[%c0, %c0_0, %c0_1] : memref<8x8x32xf32, #tpu.memory_space<vmem>>, vector<8x8x32xf32>
    %c0_2 = arith.constant 0 : index
    %c0_3 = arith.constant 0 : index
    %1 = vector.load %arg2[%c0_2, %c0_3] : memref<1x32xf32, #tpu.memory_space<vmem>>, vector<1x32xf32>
    %2 = vector.shape_cast %1 : vector<1x32xf32> to vector<1x1x32xf32>
    %3 = vector.broadcast %2 : vector<1x1x32xf32> to vector<8x8x32xf32>
    %4 = arith.mulf %0, %3 : vector<8x8x32xf32>
    %cst = arith.constant dense<0.000000e+00> : vector<8x8xf32>
    %5 = vector.multi_reduction <add>, %4, %cst [2] : vector<8x8x32xf32> to vector<8x8xf32>
    %cst_4 = arith.constant dense<0xFF800000> : vector<8xf32>
    %6 = vector.multi_reduction <maximumf>, %5, %cst_4 [1] : vector<8x8xf32> to vector<8xf32>
    %7 = vector.shape_cast %6 : vector<8xf32> to vector<8x1xf32>
    %8 = vector.broadcast %7 : vector<8x1xf32> to vector<8x8xf32>
    %9 = arith.subf %5, %8 : vector<8x8xf32>
    %10 = math.exp %9 : vector<8x8xf32>
    %cst_5 = arith.constant dense<0.000000e+00> : vector<8xf32>
    %11 = vector.multi_reduction <add>, %10, %cst_5 [1] : vector<8x8xf32> to vector<8xf32>
    %12 = vector.shape_cast %11 : vector<8xf32> to vector<8x1xf32>
    %13 = vector.broadcast %12 : vector<8x1xf32> to vector<8x8xf32>
    %14 = arith.divf %10, %13 : vector<8x8xf32>
    %15 = vector.shape_cast %14 : vector<8x8xf32> to vector<8x8x1xf32>
    %16 = vector.broadcast %15 : vector<8x8x1xf32> to vector<8x8x32xf32>
    %17 = arith.mulf %16, %0 : vector<8x8x32xf32>
    %cst_6 = arith.constant dense<0.000000e+00> : vector<8x32xf32>
    %18 = vector.multi_reduction <add>, %17, %cst_6 [1] : vector<8x8x32xf32> to vector<8x32xf32>
    %c0_7 = arith.constant 0 : index
    %c0_8 = arith.constant 0 : index
    %19 = vector.load %arg3[%c0_7, %c0_8] : memref<32x16xf32, #tpu.memory_space<vmem>>, vector<32x16xf32>
    %cst_9 = arith.constant dense<0.000000e+00> : vector<8x16xf32>
    %20 = tpu.matmul %18, %19, %cst_9 {dimension_numbers = #tpu.dot_dimension_numbers<[1], [0], [0], [1], [0, 0, 1, 1], [], []>} : vector<8x32xf32>, vector<32x16xf32>, vector<8x16xf32> -> vector<8x16xf32>
    %c0_10 = arith.constant 0 : index
    %c0_11 = arith.constant 0 : index
    %21 = vector.load %arg4[%c0_10, %c0_11] : memref<1x16xf32, #tpu.memory_space<vmem>>, vector<1x16xf32>
    %22 = vector.broadcast %21 : vector<1x16xf32> to vector<8x16xf32>
    %23 = arith.addf %20, %22 : vector<8x16xf32>
    %c0_12 = arith.constant 0 : index
    %c0_13 = arith.constant 0 : index
    %24 = vector.load %arg5[%c0_12, %c0_13] : memref<8x16xf32, #tpu.memory_space<vmem>>, vector<8x16xf32>
    tpu.vector_store %arg5[%c0_12, %c0_13], %23 {strides = array<i32>} : memref<8x16xf32, #tpu.memory_space<vmem>>, vector<8x16xf32>,
    return
  }
  func.func @transform_0(%arg0: i32) -> (i32, i32, i32) {
    %c0_i32 = arith.constant 0 : i32
    %c0_i32_0 = arith.constant 0 : i32
    %c0_i32_1 = arith.constant 0 : i32
    return %arg0, %c0_i32, %c0_i32_0 : i32, i32, i32
  }
  func.func @transform_1(%arg0: i32) -> (i32, i32) {
    %c0_i32 = arith.constant 0 : i32
    %c0_i32_0 = arith.constant 0 : i32
    %c0_i32_1 = arith.constant 0 : i32
    return %c0_i32, %c0_i32_0 : i32, i32
  }
  func.func @transform_2(%arg0: i32) -> (i32, i32) {
    %c0_i32 = arith.constant 0 : i32
    %c0_i32_0 = arith.constant 0 : i32
    %c0_i32_1 = arith.constant 0 : i32
    return %c0_i32, %c0_i32_0 : i32, i32
  }
  func.func @transform_3(%arg0: i32) -> (i32, i32) {
    %c0_i32 = arith.constant 0 : i32
    %c0_i32_0 = arith.constant 0 : i32
    %c0_i32_1 = arith.constant 0 : i32
    return %c0_i32, %c0_i32_0 : i32, i32
  }
  func.func @transform_4(%arg0: i32) -> (i32, i32) {
    %c0_i32 = arith.constant 0 : i32
    %c0_i32_0 = arith.constant 0 : i32
    return %arg0, %c0_i32 : i32, i32
  }
}

</mosaic_0001>

<bundles_post_ra>
// kernel: tpu_custom_call.1
= control target key start
LH: loop header
LB: loop body
LE: loop exit
PB: predicated region body
PF: predicated region fallthrough
CT: control target
= control target key end

     0   :  { %9 = vsyncpa [#allocation3], 0  ;;  %s1381_s0 = inlined_call_operand.hbm [shape: f32[16,8,32], index: 0, kind: input, shape index: {}]   ;;  %s1382_s1 = inlined_call_operand.vmem [shape: f32[1,32], index: 1, kind: input, shape index: {}]   ;;  %s1383_s2 = inlined_call_operand.vmem [shape: f32[32,16], index: 2, kind: input, shape index: {}]   ;;  %s1384_s3 = inlined_call_operand.vmem [shape: f32[1,16], index: 3, kind: input, shape index: {}]   ;;  %s1385_s4 = inlined_call_operand.hbm [shape: f32[16,16], index: 4, kind: output, shape index: {}]  }
   0x1   :  { %11 = vsyncpa [#allocation3 + $0x1], 0 }
   0x2   :  { %12 = vsyncpa [#allocation4], 0 }
   0x3   :  { %14 = vsyncpa [#allocation4 + $0x1], 0  ;;  %s1055_s15 = smov 0   ;;  %s1057_s16 = smov 0  }
   0x4   :  { %s1059_s17 = smov 0   ;;  %s1061_s18 = smov 0  }
   0x5 LB: > { %s1076_s19 = sadd.s32 4294967295, %s1021_s18   ;;  %s811_s20 = sadd.s32 4294967294, %s1021_s18   ;;  %s1021_s18 = sphi %s1061_s18, %s1400_s18   ;;  %s1017_s17 = sphi %s1059_s17, %s1399_s17   ;;  %s1013_s16 = sphi %s1057_s16, %s1398_s16   ;;  %s1009_s15 = sphi %s1055_s15, %s1397_s15  }
   0x6   : > { %s1080_s21 = sadd.s32 1, %s1021_s18   ;;  %s27_s22 = sadd.s32 1, %s1017_s17 }
   0x7   : > { %s24_s23 = ssub.s32 %s1021_s18, %s1080_s21  ;;  %p34_p0 = scmp.ne.s32.totalorder %s1017_s17, %s1013_s16 }
   0x8   : > { %p25_p1 = scmp.eq.s32.totalorder %s24_s23, 0  ;;  %p35_p2 = scmp.eq.s32.totalorder %s1021_s18, 0 }
   0x9   : > { %p40_p3 = scmp.ne.s32.totalorder %s1013_s16, %s1009_s15  ;;  %p41_p4 = scmp.eq.s32.totalorder %s1076_s19, 0 }
   0xa   : > { %s1092_s24 = scalar_select %p25_p1, %s1017_s17, %s27_s22  }
   0xb   : > { %p1094_p5 = por %p35_p2, %p34_p0  ;;  %p1098_p6 = por %p41_p4, %p40_p3 }
   0xc   : > { %p127_p7 = scmp.eq.s32.totalorder %s1076_s19, 1  ;;  %p133_p8 = scmp.eq.s32.totalorder %s811_s20, 1 }
   0xd   : > { %s1389_s26 = scalar_select %p1098_p6, 1, 0 }
   0xe   : > { %p856_p10 = scmp.lt.s32.totalorder %s1021_s18, 2  ;;  %p1105_p11 = por %p127_p7, %p34_p0 }
   0xf   : > { %p1109_p12 = por %p133_p8, %p40_p3  ;;  %s162_s29 = sand.u32 1, %s1017_s17  }
  0x10   : > { %s1390_s27 = scalar_select %p1105_p11, 1, 0 }
  0x11   : > { %s1391_s28 = scalar_select %p1109_p12, 1, 0 }
  0x12   : > { %s827_s30 = sshll.u32 %s1021_s18, 10  ;;  %s814_s5 = sshll.u32 %s162_s29, 6 }
  0x13   : > { %s1118_s8 = scalar_lea.hbm %s1381_s0, %s827_s30  ;;  %s166_s9 = scalar_lea.vmem [#allocation2], %s814_s5 }
  0x14   : > { %s173_s10 = sshll.u32 %s166_s9, 4  ;;  %p1122_p13 = pnand %p856_p10, %p1094_p5  ;;  %s1126_s10 = int_to_ptr.vmem [resolvable:$true] %s173_s10 }
  0x15   : > { %s1128_s12 = scalar_lea.sflag [#allocation3], %s162_s29  ;;  %s929_s13 = scalar_lea.hbm %s1118_s8, 1024 }
  0x16   : > { %p930_p0 = scmp.ne.s32.totalorder %s1118_s8, %s929_s13  ;;  %p931_p1 = pneg %p1122_p13 }
  0x17   : > { %s934_s22 = scalar_lea.hbm %s1381_s0, 2048  ;;  %p935_p4 = scmp.lt.s32.totalorder %s1118_s8, %s1381_s0 }
  0x18   : > { %p932_p2 = pnand %p931_p1, %p930_p0  ;;  %p936_p5 = scmp.lt.s32.totalorder %s934_s22, %s929_s13 }
  0x1a   : > { %p933_p3 = pneg %p932_p2  ;;  %p937_p7 = por %p936_p5, %p935_p4 }
  0x1c   : > { %p938_p8 = pnand %p937_p7, %p933_p3 }
  0x1e   : > { %941 = shalt.err (!%p938_p8)
}
  0x1f   : > { %s942_s29 = scalar_lea.vmem %s1126_s10, 1024  ;;  %s1023_s30 = smov [#allocation2]  }
  0x20   : > { %p943_p10 = scmp.ne.s32.totalorder %s1126_s10, %s942_s29  ;;  %s947_s5 = sshll.u32 %s1023_s30, 4  ;;  %s948_s5 = int_to_ptr.vmem [resolvable:$false] %s947_s5 }
  0x21   : > { %s949_s6 = scalar_lea.vmem %s948_s5, 2048  ;;  %p950_p2 = scmp.lt.s32.totalorder %s1126_s10, %s948_s5 }
  0x22   : > { %p945_p9 = pnand %p943_p10, %p931_p1  ;;  %p951_p12 = scmp.lt.s32.totalorder %s949_s6, %s942_s29 }
  0x24   : > { %p946_p0 = pneg %p945_p9  ;;  %p952_p11 = por %p951_p12, %p950_p2 }
  0x26   : > { %p953_p6 = pnand %p952_p11, %p946_p0 }
  0x28   : > { %956 = shalt.err (!%p953_p6)
}
  0x29   : > { %s1024_s7 = smov 128   ;;  %s1025_s9 = smov 8  }
  0x2a   : > { %851 = dma.hbm_to_vmem [thread:$0]  (!%p1122_p13), %s1118_s8, 1024, %s1126_s10, %s1128_s12, %s1024_s7, %s1024_s7, %s1025_s9  }
  0x2b   : > { %p817_p9 = scmp.ge.s32.totalorder %s1021_s18, 1  ;;  %p181_p1 = scmp.lt.s32.totalorder %s1021_s18, 3 }
  0x2d   : > { %p182_p3 = pnand %p817_p9, %p181_p1 }
  0x2e   : > { %s1152_s13 = sand.u32 (!%p182_p3), 1, %s1013_s16   ;;  %p1393_p6 = scmp.ne.s32.totalorder (!%p182_p3), %s1389_s26, 0 }
  0x2f   : > { %185 = sbr.rel (%p182_p3) target bundleno = 1055 (0x41f), region = 36  ;;  %s818_s14 = sshll.u32 (!%p182_p3), %s1152_s13, 6 }
  0x30   : > { %s188_s20 = scalar_lea.sflag (!%p182_p3), [#allocation3], %s1152_s13  ;;  %s191_s22 = scalar_lea.vmem (!%p182_p3), [#allocation2], %s818_s14 }
  0x34   : > { %1000 = dma.done.wait (%p1393_p6), %s188_s20, 1024  }
  0x35   : > { %1002 = vsyncadd (%p1393_p6), %s188_s20, 4294966272  ;;  %v1160_v0 = vld [vmem:[%s191_s22] sm:$0xff]  ;;  %vm240_vm0 = vcmask 261120   ;;  %v1165_v2 = vld [vmem:[%s191_s22 + $0x10] sm:$0xff]  ;;  %v273_v25 = vlaneseq  ;;  %vm307_vm1 = vcmask 1041409   ;;  %vm309_vm2 = vcmask 1042434  }
  0x36   : > { %v820_v1 = vld [vmem:[%s1382_s1] ss:$0 sm:$0xff]  ;;  %v1169_v5 = vld [vmem:[%s191_s22 + $0x8] sm:$0xff]  ;;  %v1171_v6 = vld [vmem:[%s191_s22 + $0x18] sm:$0xff]  ;;  %vm311_vm3 = vcmask 1043459   ;;  %vm313_vm4 = vcmask 1044484  }
  0x37   : > { %v232_v3 = vmul.f32 %v820_v1, %v1160_v0  ;;  %v234_v4 = vmul.f32 %v820_v1, %v1165_v2  ;;  %v233_v7 = vmul.f32 %v820_v1, %v1169_v5  ;;  %v235_v8 = vmul.f32 %v820_v1, %v1171_v6  ;;  %v1175_v9 = vld [vmem:[%s191_s22 + $0x20] sm:$0xff]  ;;  %v1177_v10 = vld [vmem:[%s191_s22 + $0x28] sm:$0xff]  ;;  %v1185_v17 = vld [vmem:[%s191_s22 + $0x30] sm:$0xff]  ;;  %s819_s6 = sshll.u32 %s1152_s13, 3  ;;  %s824_s14 = sshll.u32 %s1076_s19, 7 }
  0x38   : > { %v236_v15 = vmul.f32 %v820_v1, %v1175_v9  ;;  %v237_v16 = vmul.f32 %v820_v1, %v1177_v10  ;;  %v1187_v18 = vld [vmem:[%s191_s22 + $0x38] sm:$0xff]  ;;  %v238_v21 = vmul.f32 %v820_v1, %v1185_v17  ;;  %v274_v26 = vand.u32 127, %v273_v25  ;;  %s215_s20 = scalar_lea.vmem [#allocation5], %s819_s6  ;;  %s1344_s26 = scalar_lea.hbm %s1385_s4, %s824_s14 }
  0x39   : > { %v241_v11 = vsel %vm240_vm0, %v232_v3, 0.0  ;;  %v247_v12 = vsel %vm240_vm0, %v234_v4, 0.0  ;;  %v244_v13 = vsel %vm240_vm0, %v233_v7, 0.0  ;;  %v250_v14 = vsel %vm240_vm0, %v235_v8, 0.0  ;;  %s741_s22 = sshll.u32 %s215_s20, 4  ;;  %s728_s11 = scalar_lea.sflag [#allocation4], %s1152_s13  ;;  %s742_s22 = int_to_ptr.vmem [resolvable:$true] %s741_s22 }
  0x3a   : > { %242 = vadd.xlane.f32.xlu0 %v241_v11  ;;  %248 = vadd.xlane.f32.xlu1 %v247_v12  ;;  %v253_v19 = vsel %vm240_vm0, %v236_v15, 0.0  ;;  %v256_v20 = vsel %vm240_vm0, %v237_v16, 0.0  ;;  %v239_v22 = vmul.f32 %v820_v1, %v1187_v18  ;;  %v259_v23 = vsel %vm240_vm0, %v238_v21, 0.0  ;;  %s957_s12 = scalar_lea.vmem %s742_s22, 128  ;;  %p1394_p12 = scmp.ne.s32.totalorder %s1390_s27, 0 }
  0x3b   : > { %v1195_v27 = vshrl.u32 %v273_v25, 7  ;;  %vm315_vm5 = vcmask 1045509   ;;  %vm317_vm6 = vcmask 1046534   ;;  %vm319_vm7 = vcmask 1047559   ;;  %p958_p11 = scmp.ne.s32.totalorder %s742_s22, %s957_s12  ;;  %s1029_s19 = smov [#allocation5]  }
  0x3c   : > { %v262_v24 = vsel %vm240_vm0, %v239_v22, 0.0  ;;  %vm322_vm8 = vcmask 64512   ;;  %v1026_v53 = vmov 0   ;;  %vm1028_vm9 = vmmov 0   ;;  %s961_s23 = sshll.u32 %s1029_s19, 4  ;;  %s962_s23 = int_to_ptr.vmem [resolvable:$false] %s961_s23 }
  0x3d   : > { %v1198_v30 = vsub.s32 %v274_v26, %v1195_v27  ;;  %896 = vset.pattern.permute.xlu0 %v1026_v53  ;;  %895 = vset.pattern.permute.xlu1 %v1026_v53  ;;  %v329_v54 = vsub.s32 0, %v1195_v27  ;;  %v333_v55 = vsub.s32 1, %v1195_v27  ;;  %v337_v56 = vsub.s32 2, %v1195_v27  ;;  %p959_p13 = pnand %p958_p11, %p1394_p12  ;;  %s963_s25 = scalar_lea.vmem %s962_s23, 256 }
  0x3e   : > { %245 = vadd.xlane.f32.xlu0 %v244_v13  ;;  %251 = vadd.xlane.f32.xlu1 %v250_v14  ;;  %v341_v57 = vsub.s32 3, %v1195_v27  ;;  %v345_v62 = vsub.s32 4, %v1195_v27  ;;  %v349_v11 = vsub.s32 5, %v1195_v27  ;;  %v353_v15 = vsub.s32 6, %v1195_v27  ;;  %p964_p5 = scmp.lt.s32.totalorder %s742_s22, %s962_s23  ;;  %p965_p7 = scmp.lt.s32.totalorder %s963_s25, %s957_s12 }
  0x3f   : > { %v357_v21 = vsub.s32 7, %v1195_v27  ;;  %vm725_vm10 = vcmask 130048   ;;  %p960_p4 = pneg %p959_p13 }
  0x40   : > { %p966_p8 = por %p965_p7, %p964_p5 }
  0x42   : > { %254 = vadd.xlane.f32.xlu0 %v253_v19  ;;  %257 = vadd.xlane.f32.xlu1 %v256_v20  ;;  %p967_p10 = pnand %p966_p8, %p960_p4 }
  0x46   : > { %260 = vadd.xlane.f32.xlu0 %v259_v23  ;;  %263 = vadd.xlane.f32.xlu1 %v262_v24 }
  0xc3   : > { %v243_v28 = vpop.xlane.xlu0 %242  ;;  %v249_v29 = vpop.xlane.xlu1 %248 }
  0xc4   : > { %v278_v33 = vrot.slane %v243_v28, %v1198_v30  ;;  %v286_v36 = vrot.slane %v249_v29, %v1198_v30 }
  0xc7   : > { %v246_v31 = vpop.xlane.xlu0 %245  ;;  %v252_v32 = vpop.xlane.xlu1 %251 }
  0xc8   : > { %v282_v34 = vrot.slane %v246_v31, %v1198_v30  ;;  %v290_v35 = vrot.slane %v252_v32, %v1198_v30 }
  0xca   : > { %v308_v37 = vsel %vm307_vm1, %v282_v34, %v278_v33 }
  0xcb   : > { %v310_v38 = vsel %vm309_vm2, %v286_v36, %v308_v37  ;;  %v255_v39 = vpop.xlane.xlu0 %254  ;;  %v258_v40 = vpop.xlane.xlu1 %257 }
  0xcc   : > { %v312_v41 = vsel %vm311_vm3, %v290_v35, %v310_v38  ;;  %v294_v42 = vrot.slane %v255_v39, %v1198_v30  ;;  %v298_v43 = vrot.slane %v258_v40, %v1198_v30 }
  0xce   : > { %v314_v44 = vsel %vm313_vm4, %v294_v42, %v312_v41 }
  0xcf   : > { %v261_v45 = vpop.xlane.xlu0 %260  ;;  %v264_v46 = vpop.xlane.xlu1 %263  ;;  %v316_v49 = vsel %vm315_vm5, %v298_v43, %v314_v44 }
  0xd0   : > { %v302_v47 = vrot.slane %v261_v45, %v1198_v30  ;;  %v306_v48 = vrot.slane %v264_v46, %v1198_v30 }
  0xd2   : > { %v318_v50 = vsel %vm317_vm6, %v302_v47, %v316_v49 }
  0xd3   : > { %v320_v51 = vsel %vm319_vm7, %v306_v48, %v318_v50 }
  0xd4   : > { %v323_v52 = vsel %vm322_vm8, %v320_v51, -inf }
  0xd5   : > { %324 = vmax.xlane.f32.xlu0 %v323_v52 }
 0x15e   : > { %v325_v58 = vpop.xlane.xlu0 %324 }
 0x15f   : > { %v330_v59 = vrot.slane %v325_v58, %v329_v54  ;;  %v334_v60 = vrot.slane %v325_v58, %v333_v55  ;;  %v338_v61 = vrot.slane %v325_v58, %v337_v56  ;;  %v342_v63 = vrot.slane %v325_v58, %v341_v57 }
 0x160   : > { %v346_v12 = vrot.slane %v325_v58, %v345_v62  ;;  %v350_v16 = vrot.slane %v325_v58, %v349_v11  ;;  %v354_v22 = vrot.slane %v325_v58, %v353_v15  ;;  %v358_v25 = vrot.slane %v325_v58, %v357_v21 }
 0x161   : > { %v367_v1 = vsub.f32 %v243_v28, %v330_v59  ;;  %v368_v3 = vsub.f32 %v246_v31, %v334_v60  ;;  %v369_v4 = vsub.f32 %v249_v29, %v338_v61  ;;  %v370_v13 = vsub.f32 %v252_v32, %v342_v63 }
 0x162   : > { %v371_v19 = vsub.f32 %v255_v39, %v346_v12  ;;  %v372_v23 = vsub.f32 %v258_v40, %v350_v16  ;;  %v373_v26 = vsub.f32 %v261_v45, %v354_v22  ;;  %v374_v32 = vsub.f32 %v264_v46, %v358_v25 }
 0x163   : > { %v375_v7 = vmul.f32 1.442695, %v367_v1  ;;  %v377_v8 = vmul.f32 1.442695, %v368_v3  ;;  %v379_v14 = vmul.f32 1.442695, %v369_v4 }
 0x164   : > { %v381_v20 = vmul.f32 1.442695, %v370_v13  ;;  %v383_v24 = vmul.f32 1.442695, %v371_v19  ;;  %v385_v28 = vmul.f32 1.442695, %v372_v23 }
 0x165   : > { %897 = vpow2.f32 %v375_v7  ;;  %v387_v33 = vmul.f32 1.442695, %v373_v26  ;;  %v389_v35 = vmul.f32 1.442695, %v374_v32 }
 0x166   : > { %899 = vpow2.f32 %v377_v8 }
 0x167   : > { %901 = vpow2.f32 %v379_v14 }
 0x168   : > { %903 = vpow2.f32 %v381_v20 }
 0x169   : > { %905 = vpow2.f32 %v383_v24 }
 0x16a   : > { %907 = vpow2.f32 %v385_v28 }
 0x16b   : > { %909 = vpow2.f32 %v387_v33 }
 0x16c   : > { %911 = vpow2.f32 %v389_v35  ;;  %v1027_v35 = vmov 0.0  }
 0x16d   : > { %833 = vmatprep.subr.mxu0 %v1027_v35  ;;  %841 = vmatprep.mubr.msk.f32.mxu0 %vm1028_vm9, %v1027_v35 }
 0x172   : > { %v898_v29 = vpop.eup %897 }
 0x173   : > { %v1240_v31 = vpop.eup %899  ;;  %400 = vperm.xlu1 %895, %v898_v29  }
 0x174   : > { %403 = vperm.xlu0 %896, %v1240_v31   ;;  %v1243_v34 = vpop.eup %901 }
 0x175   : > { %v1246_v36 = vpop.eup %903 }
 0x176   : > { %v1249_v37 = vpop.eup %905 }
 0x177   : > { %406 = vperm.xlu1 %895, %v1243_v34   ;;  %v1252_v38 = vpop.eup %907 }
 0x178   : > { %v1255_v39 = vpop.eup %909 }
 0x179   : > { %v1258_v40 = vpop.eup %911 }
 0x17b   : > { %409 = vperm.xlu1 %895, %v1246_v36  }
 0x17f   : > { %412 = vperm.xlu1 %895, %v1249_v37  }
 0x183   : > { %415 = vperm.xlu1 %895, %v1252_v38  }
 0x187   : > { %418 = vperm.xlu1 %895, %v1255_v39  }
 0x18b   : > { %421 = vperm.xlu1 %895, %v1258_v40  }
 0x1ee   : > { %v401_v41 = vpop.permute.xlu1 %400 }
 0x1ef   : > { %v404_v45 = vpop.permute.xlu0 %403  ;;  %v426_v48 = vrot.slane %v401_v41, %v1198_v30 }
 0x1f0   : > { %v430_v47 = vrot.slane %v404_v45, %v1198_v30 }
 0x1f2   : > { %v407_v42 = vpop.permute.xlu1 %406  ;;  %v455_v53 = vsel %vm307_vm1, %v430_v47, %v426_v48 }
 0x1f3   : > { %v434_v49 = vrot.slane %v407_v42, %v1198_v30 }
 0x1f5   : > { %v456_v59 = vsel %vm309_vm2, %v434_v49, %v455_v53 }
 0x1f6   : > { %v410_v43 = vpop.permute.xlu1 %409 }
 0x1f7   : > { %v438_v50 = vrot.slane %v410_v43, %v1198_v30 }
 0x1f9   : > { %v457_v61 = vsel %vm311_vm3, %v438_v50, %v456_v59 }
 0x1fa   : > { %v413_v44 = vpop.permute.xlu1 %412 }
 0x1fb   : > { %v442_v51 = vrot.slane %v413_v44, %v1198_v30 }
 0x1fd   : > { %v458_v63 = vsel %vm313_vm4, %v442_v51, %v457_v61 }
 0x1fe   : > { %v416_v46 = vpop.permute.xlu1 %415 }
 0x1ff   : > { %v446_v58 = vrot.slane %v416_v46, %v1198_v30 }
 0x201   : > { %v459_v3 = vsel %vm315_vm5, %v446_v58, %v458_v63 }
 0x202   : > { %v419_v52 = vpop.permute.xlu1 %418 }
 0x203   : > { %v450_v60 = vrot.slane %v419_v52, %v1198_v30 }
 0x205   : > { %v460_v7 = vsel %vm317_vm6, %v450_v60, %v459_v3 }
 0x206   : > { %v422_v1 = vpop.permute.xlu1 %421 }
 0x207   : > { %v454_v4 = vrot.slane %v422_v1, %v1198_v30 }
 0x209   : > { %v461_v8 = vsel %vm319_vm7, %v454_v4, %v460_v7 }
 0x20a   : > { %v463_v12 = vsel %vm322_vm8, %v461_v8, 0.0 }
 0x20b   : > { %464 = vadd.xlane.f32.xlu1 %v463_v12 }
 0x294   : > { %v465_v13 = vpop.xlane.xlu1 %464 }
 0x295   : > { %v470_v14 = vrot.slane %v465_v13, %v329_v54  ;;  %v474_v16 = vrot.slane %v465_v13, %v333_v55  ;;  %v478_v19 = vrot.slane %v465_v13, %v337_v56  ;;  %v482_v30 = vrot.slane %v465_v13, %v341_v57 }
 0x296   : > { %v486_v20 = vrot.slane %v465_v13, %v345_v62  ;;  %v490_v54 = vrot.slane %v465_v13, %v349_v11  ;;  %v494_v56 = vrot.slane %v465_v13, %v353_v15  ;;  %v498_v62 = vrot.slane %v465_v13, %v357_v21 }
 0x297   : > { %913 = vrcp.f32 %v470_v14 }
 0x298   : > { %915 = vrcp.f32 %v474_v16 }
 0x299   : > { %917 = vrcp.f32 %v478_v19 }
 0x29a   : > { %919 = vrcp.f32 %v482_v30 }
 0x29b   : > { %921 = vrcp.f32 %v486_v20 }
 0x29c   : > { %923 = vrcp.f32 %v490_v54 }
 0x29d   : > { %925 = vrcp.f32 %v494_v56 }
 0x29e   : > { %927 = vrcp.f32 %v498_v62 }
 0x2a4   : > { %v914_v22 = vpop.eup %913 }
 0x2a5   : > { %v508_v23 = vmul.f32 %v914_v22, %v898_v29  ;;  %v916_v55 = vpop.eup %915 }
 0x2a6   : > { %v510_v24 = vmul.f32 %v916_v55, %v1240_v31  ;;  %v918_v57 = vpop.eup %917 }
 0x2a7   : > { %525 = vperm.xlu0 %896, %v508_v23   ;;  %v512_v25 = vmul.f32 %v918_v57, %v1243_v34  ;;  %v920_v26 = vpop.eup %919  ;;  %v630_v34 = vld [vmem:[%s1383_s2 + $0x18] sm:$0xff] }
 0x2a8   : > { %v514_v11 = vmul.f32 %v920_v26, %v1246_v36  ;;  %v922_v28 = vpop.eup %921  ;;  %v629_v36 = vld [vmem:[%s1383_s2 + $0x10] sm:$0xff]  ;;  %834 = vmatpush3.msra.mxu0 %v630_v34 }
 0x2a9   : > { %v516_v15 = vmul.f32 %v922_v28, %v1249_v37  ;;  %v924_v29 = vpop.eup %923  ;;  %835 = vmatprep.subr.mxu0 %v1027_v35  ;;  %v628_v37 = vld [vmem:[%s1383_s2 + $0x8] sm:$0xff] }
 0x2aa   : > { %v518_v31 = vmul.f32 %v924_v29, %v1252_v38  ;;  %v926_v32 = vpop.eup %925  ;;  %836 = vmatpush3.msra.mxu0 %v629_v36  ;;  %v627_v38 = vld [vmem:[%s1383_s2] sm:$0xff] }
 0x2ab   : > { %530 = vperm.xlu0 %896, %v510_v24   ;;  %v520_v27 = vmul.f32 %v926_v32, %v1255_v39  ;;  %v928_v21 = vpop.eup %927  ;;  %837 = vmatprep.subr.mxu0 %v1027_v35 }
 0x2ac   : > { %v522_v33 = vmul.f32 %v928_v21, %v1258_v40  ;;  %838 = vmatpush3.msra.mxu0 %v628_v37 }
 0x2ad   : > { %839 = vmatprep.subr.mxu0 %v1027_v35 }
 0x2ae   : > { %840 = vmatpush3.msra.mxu0 %v627_v38 }
 0x2af   : > { %535 = vperm.xlu0 %896, %v512_v25  }
 0x2b3   : > { %540 = vperm.xlu0 %896, %v514_v11  }
 0x2b7   : > { %545 = vperm.xlu0 %896, %v516_v15  }
 0x2bb   : > { %550 = vperm.xlu0 %896, %v518_v31  }
 0x2bf   : > { %555 = vperm.xlu0 %896, %v520_v27  }
 0x2c3   : > { %560 = vperm.xlu0 %896, %v522_v33  }
 0x322   : > { %v526_v39 = vpop.permute.xlu0 %525 }
 0x323   : > { %v563_v43 = vmul.f32 %v526_v39, %v1160_v0 }
 0x325   : > { %v571_v48 = vsel %vm240_vm0, %v563_v43, 0.0 }
 0x326   : > { %v531_v40 = vpop.permute.xlu0 %530  ;;  %v572_v53 = vrot.slane %v571_v48, 4 }
 0x327   : > { %v564_v41 = vmul.f32 %v531_v40, %v1169_v5 }
 0x328   : > { %v573_v61 = vadd.f32 %v572_v53, %v571_v48 }
 0x329   : > { %v578_v45 = vsel %vm240_vm0, %v564_v41, 0.0 }
 0x32a   : > { %v536_v42 = vpop.permute.xlu0 %535  ;;  %v579_v50 = vrot.slane %v578_v45, 4  ;;  %v574_v13 = vrot.slane %v573_v61, 2 }
 0x32b   : > { %v565_v44 = vmul.f32 %v536_v42, %v1165_v2 }
 0x32c   : > { %v580_v59 = vadd.f32 %v579_v50, %v578_v45  ;;  %v575_v55 = vadd.f32 %v574_v13, %v573_v61 }
 0x32d   : > { %v585_v46 = vsel %vm240_vm0, %v565_v44, 0.0 }
 0x32e   : > { %v541_v47 = vpop.permute.xlu0 %540  ;;  %v586_v51 = vrot.slane %v585_v46, 4 }
 0x32f   : > { %v566_v49 = vmul.f32 %v541_v47, %v1171_v6  ;;  %v581_v6 = vrot.slane %v580_v59, 2 }
 0x330   : > { %v587_v2 = vadd.f32 %v586_v51, %v585_v46 }
 0x331   : > { %v592_v52 = vsel %vm240_vm0, %v566_v49, 0.0  ;;  %v582_v20 = vadd.f32 %v581_v6, %v580_v59 }
 0x332   : > { %v593_v5 = vrot.slane %v592_v52, 4  ;;  %v546_v58 = vpop.permute.xlu0 %545  ;;  %v588_v8 = vrot.slane %v587_v2, 2 }
 0x333   : > { %v567_v0 = vmul.f32 %v546_v58, %v1175_v9  ;;  %v583_v26 = vrot.slane %v582_v20, 1 }
 0x334   : > { %v594_v63 = vadd.f32 %v593_v5, %v592_v52  ;;  %v589_v54 = vadd.f32 %v588_v8, %v587_v2  ;;  %v821_v5 = vld [vmem:[%s1384_s3] ss:$0 sm:$0xff] }
 0x335   : > { %v599_v60 = vsel %vm240_vm0, %v567_v0, 0.0  ;;  %v584_v33 = vadd.f32 %v583_v26, %v582_v20 }
 0x336   : > { %v600_v1 = vrot.slane %v599_v60, 4  ;;  %v551_v3 = vpop.permute.xlu0 %550  ;;  %v595_v14 = vrot.slane %v594_v63, 2  ;;  %v590_v15 = vrot.slane %v589_v54, 1 }
 0x337   : > { %v568_v4 = vmul.f32 %v551_v3, %v1177_v10 }
 0x338   : > { %v601_v7 = vadd.f32 %v600_v1, %v599_v60  ;;  %v596_v56 = vadd.f32 %v595_v14, %v594_v63  ;;  %v591_v37 = vadd.f32 %v590_v15, %v589_v54 }
 0x339   : > { %v606_v12 = vsel %vm240_vm0, %v568_v4, 0.0 }
 0x33a   : > { %v607_v16 = vrot.slane %v606_v12, 4  ;;  %v556_v19 = vpop.permute.xlu0 %555  ;;  %v602_v9 = vrot.slane %v601_v7, 2  ;;  %v597_v31 = vrot.slane %v596_v56, 1 }
 0x33b   : > { %v569_v30 = vmul.f32 %v556_v19, %v1185_v17  ;;  %v576_v17 = vrot.slane %v575_v55, 1 }
 0x33c   : > { %v608_v22 = vadd.f32 %v607_v16, %v606_v12  ;;  %v603_v62 = vadd.f32 %v602_v9, %v601_v7  ;;  %v598_v39 = vadd.f32 %v597_v31, %v596_v56 }
 0x33d   : > { %v613_v23 = vsel %vm240_vm0, %v569_v30, 0.0  ;;  %v577_v38 = vadd.f32 %v576_v17, %v575_v55 }
 0x33e   : > { %v609_v10 = vrot.slane %v608_v22, 2  ;;  %v614_v24 = vrot.slane %v613_v23, 4  ;;  %v561_v57 = vpop.permute.xlu0 %560  ;;  %v604_v21 = vrot.slane %v603_v62, 1 }
 0x33f   : > { %v570_v25 = vmul.f32 %v561_v57, %v1187_v18  ;;  %v646_v42 = vsel %vm307_vm1, %v584_v33, %v577_v38 }
 0x340   : > { %v610_v11 = vadd.f32 %v609_v10, %v608_v22  ;;  %v615_v28 = vadd.f32 %v614_v24, %v613_v23  ;;  %v605_v41 = vadd.f32 %v604_v21, %v603_v62  ;;  %v647_v45 = vsel %vm309_vm2, %v591_v37, %v646_v42 }
 0x341   : > { %v620_v29 = vsel %vm240_vm0, %v570_v25, 0.0  ;;  %v648_v47 = vsel %vm311_vm3, %v598_v39, %v647_v45 }
 0x342   : > { %v616_v32 = vrot.slane %v615_v28, 2  ;;  %v621_v27 = vrot.slane %v620_v29, 4  ;;  %v611_v34 = vrot.slane %v610_v11, 1  ;;  %v649_v49 = vsel %vm313_vm4, %v605_v41, %v648_v47 }
 0x344   : > { %v617_v35 = vadd.f32 %v616_v32, %v615_v28  ;;  %v622_v36 = vadd.f32 %v621_v27, %v620_v29  ;;  %v612_v43 = vadd.f32 %v611_v34, %v610_v11 }
 0x346   : > { %v618_v40 = vrot.slane %v617_v35, 1  ;;  %v623_v18 = vrot.slane %v622_v36, 2  ;;  %v650_v51 = vsel %vm315_vm5, %v612_v43, %v649_v49 }
 0x348   : > { %v624_v44 = vadd.f32 %v623_v18, %v622_v36  ;;  %v619_v46 = vadd.f32 %v618_v40, %v617_v35 }
 0x34a   : > { %v625_v48 = vrot.slane %v624_v44, 1  ;;  %v651_v52 = vsel %vm317_vm6, %v619_v46, %v650_v51 }
 0x34c   : > { %v626_v50 = vadd.f32 %v625_v48, %v624_v44 }
 0x34e   : > { %v652_v53 = vsel %vm319_vm7, %v626_v50, %v651_v52 }
 0x34f   : > { %842 = vmatmul.mubr.msk.f32.vlgmr.msra.gmra.mxu0 %vm240_vm0, %v652_v53 }
 0x40f   : > { %v721_v58 = vpop.f32.mrf.mxu0 }
 0x410   : > { %v722_v0 = vadd.f32 %v821_v5, %v721_v58 }
 0x411   : > { %v843_v59 = vpop.f32.mrf.mxu0 }
 0x412   : > { %726 = vst.msk [vmem:[%s215_s20] sm:$0xff] %vm725_vm10, %v722_v0 }
 0x413   : > { %970 = shalt.err (!%p967_p10)
}
 0x414   : > { %s971_s29 = scalar_lea.hbm %s1344_s26, 128  ;;  %s975_s5 = scalar_lea.hbm %s1385_s4, 256 }
 0x415   : > { %p972_p0 = scmp.ne.s32.totalorder %s1344_s26, %s971_s29  ;;  %p976_p1 = scmp.lt.s32.totalorder %s1344_s26, %s1385_s4 }
 0x416   : > { %p977_p3 = scmp.lt.s32.totalorder %s975_s5, %s971_s29 }
 0x417   : > { %p973_p2 = pnand %p972_p0, %p1394_p12 }
 0x418   : > { %p978_p6 = por %p977_p3, %p976_p1 }
 0x419   : > { %p974_p9 = pneg %p973_p2 }
 0x41b   : > { %p979_p11 = pnand %p978_p6, %p974_p9 }
 0x41d   : > { %982 = shalt.err (!%p979_p11)
}
 0x41e   : > { %846 = dma.vmem_to_hbm [thread:$0]  (%p1394_p12), %s742_s22, 128, %s1344_s26, %s728_s11  }
 0x41f PF: > { %s753_s9 = sand.u32 1, %s1009_s15   ;;  %p1395_p13 = scmp.ne.s32.totalorder %s1391_s28, 0 }
 0x420   : > { %p1396_p4 = scmp.ge.s32.totalorder %s1021_s18, 2  ;;  %s754_s14 = scalar_lea.sflag [#allocation4], %s753_s9 }
 0x422   : > { %p853_p5 = pnand %p1396_p4, %p1395_p13 }
 0x424   : > { %p854_p7 = pneg %p853_p5 }
 0x426   : > { %1004 = dma.done.wait (%p854_p7), %s754_s14, 128  }
 0x427   : > { %1006 = vsyncadd (%p854_p7), %s754_s14, 4294967168  ;;  %p17_p8 = scmp.ge.s32.totalorder %s1080_s21, 4   ;;  %s1397_s15 = smov %s1013_s16 }
 0x428   : > { %s1398_s16 = smov %s1017_s17  ;;  %s1399_s17 = smov %s1092_s24 }
 0x429   : > { %s1400_s18 = smov %s1080_s21  ;;  %19 = sbr.rel (!%p17_p8) target bundleno = 5 (0x5), region = 81 }
 0x42e   :  { %759 = vsyncpa [#allocation3], 1 }
 0x42f   :  { %761 = vsyncpa [#allocation3 + $0x1], 1 }
 0x430   :  { %762 = vsyncpa [#allocation4], 1 }
 0x431   :  { %764 = vsyncpa [#allocation4 + $0x1], 1 }

</bundles_post_ra>
